<compile_context>
chip_gen: v7x
topology: tpu7x:2x2x1
jax: 0.10.0
libtpu: 0.0.40
codegen_flags: <defaults>
</compile_context>

<pallas_src>
import functools
import math

import numpy as np

import jax
import jax.numpy as jnp
from jax import lax
from jax.experimental import pallas as pl
from jax.experimental.pallas import tpu as pltpu

LN_EPS = 1e-12  # matches nn.LayerNorm(embedding_features, eps=1e-12)


# ----------------------------------------------------------------------------
# Pallas kernel: channel-first fused (x + pos_plus_type) -> LayerNorm -> out
# Block layout: (C, hw_tile) -- channels on sublanes, H*W on the lane axis.
# ----------------------------------------------------------------------------
def _make_embed_ln_kernel(one_pass: bool):
    def kernel(x_ref, pos_ref, gamma_ref, beta_ref, o_ref):
        x = x_ref[...].astype(jnp.float32)      # (C, T)
        p = pos_ref[...].astype(jnp.float32)    # (C, T)  batch-invariant tile
        g = gamma_ref[...].astype(jnp.float32)  # (C, 1)
        b = beta_ref[...].astype(jnp.float32)   # (C, 1)

        s = x + p
        # LayerNorm over the channel (sublane) axis; biased variance like torch.
        mean = jnp.mean(s, axis=0, keepdims=True)                 # (1, T) via XLU
        if one_pass:
            # One-pass stats: no second full-block live value (no vreg spills at
            # large C); f32 accumulation keeps cancellation negligible.
            msq = jnp.mean(s * s, axis=0, keepdims=True)
            var = jnp.maximum(msq - mean * mean, 0.0)
            inv = lax.rsqrt(var + LN_EPS)
            o_ref[...] = ((s - mean) * (inv * g) + b).astype(o_ref.dtype)
        else:
            centered = s - mean
            var = jnp.mean(centered * centered, axis=0, keepdims=True)
            inv = lax.rsqrt(var + LN_EPS)
            o_ref[...] = (centered * (inv * g) + b).astype(o_ref.dtype)

    return kernel


def _round_up(x, m):
    return ((x + m - 1) // m) * m


def _default_target_block_bytes():
    """Per-generation streamed-block size (review: 4 MiB v6e/v7x, 1 MiB v5e)."""
    kind = ""
    try:
        kind = jax.devices()[0].device_kind.lower()
    except Exception:
        pass
    if ("v5 lite" in kind) or ("v5e" in kind) or ("v5lite" in kind):
        target = 1 << 20   # ~0.8 TB/s HBM: 1 MiB already ~87% of roofline
    else:
        target = 4 << 20   # v6e / v7x: push toward ~90% of roofline
    # Keep the pipelined footprint (~6x block: double-buffered x/pos/out) within
    # a comfortable fraction of physical VMEM (handles v7x's 64 MiB).
    try:
        vmem = int(pltpu.get_tpu_info().vmem_capacity_bytes)
        target = min(target, max(1 << 20, vmem // 16))
    except Exception:
        pass
    return target


def _choose_hw_tile(hw, c, elem_bytes, target_block_bytes):
    """Multiple-of-128 lane tile sized to ~target_block_bytes per streamed block.
    When H*W is lane-aligned, pick an exact divisor (no masked boundary block);
    otherwise rely on a cdiv grid with a masked boundary block."""
    lane = 128
    per_lane_bytes = max(1, c * elem_bytes)
    cap = max(lane, (target_block_bytes // per_lane_bytes) // lane * lane)
    hw_padded = _round_up(hw, lane)
    tile = min(cap, hw_padded)
    if hw % lane == 0:
        while hw % tile != 0:   # 128 divides hw here -> terminates
            tile -= lane
    return tile


def fused_add_layernorm_nchw(x_bchw, pos_cf, gamma, beta, *, target_block_bytes=None):
    """x_bchw: [B, C, HW] (channel-first view of NCHW; free reshape).
    pos_cf: [C, HW] (position + token-type already folded in);
    gamma/beta: [C].  Returns LayerNorm-over-C(x + pos_cf) in [B, C, HW]."""
    B, C, HW = x_bchw.shape
    itemsize = jnp.dtype(x_bchw.dtype).itemsize          # true dtype bytes
    if target_block_bytes is None:
        target_block_bytes = _default_target_block_bytes()
    hw_tile = _choose_hw_tile(HW, C, itemsize, target_block_bytes)
    num_tiles = pl.cdiv(HW, hw_tile)                     # masked boundary if needed

    pos_cf = pos_cf.astype(x_bchw.dtype)                 # stream pos in input dtype
    gamma_2d = gamma.reshape(C, 1).astype(jnp.float32)
    beta_2d = beta.reshape(C, 1).astype(jnp.float32)

    # Grid = (hw_tiles, B): batch is the inner axis, so the pos tile (whose
    # index_map ignores b) stays resident in VMEM across the whole batch.
    x_spec = pl.BlockSpec((None, C, hw_tile), lambda t, b: (b, 0, t))
    pos_spec = pl.BlockSpec((C, hw_tile), lambda t, b: (0, t))   # batch-invariant
    vec_spec = pl.BlockSpec((C, 1), lambda t, b: (0, 0))         # grid-invariant

    block_bytes = C * hw_tile * itemsize
    # Double-buffered x + pos + out (~6 blocks) plus small headroom.
    vmem_limit = min(max(6 * block_bytes + (2 << 20), 8 << 20), 64 << 20)

    cost = pl.CostEstimate(
        flops=7 * B * C * HW,                 # add + stats + normalize
        transcendentals=B * HW,               # one rsqrt per (b, lane)
        bytes_accessed=2 * B * C * HW * itemsize + C * HW * itemsize + 8 * C,
    )

    kernel = _make_embed_ln_kernel(one_pass=(C >= 256))
    return pl.pallas_call(
        kernel,
        out_shape=jax.ShapeDtypeStruct((B, C, HW), x_bchw.dtype),
        grid=(num_tiles, B),
        in_specs=[x_spec, pos_spec, vec_spec, vec_spec],
        out_specs=x_spec,
        compiler_params=pltpu.CompilerParams(
            dimension_semantics=("parallel", "parallel"),
            vmem_limit_bytes=int(vmem_limit),
        ),
        cost_estimate=cost,
    )(x_bchw, pos_cf, gamma_2d, beta_2d)


# ----------------------------------------------------------------------------
# Sinusoidal position tables (shape-only, batch-free; DETR-style,
# is_custom_position_ids=False). Built once per shape with numpy (lru_cache) and
# embedded as XLA constants -> never re-materialized per forward.
# ----------------------------------------------------------------------------
@functools.lru_cache(maxsize=None)
def _sinusoidal_pos_2d_cf(H, W, C, temperature=10000.0, scale=2.0 * math.pi):
    """Channel-first 2D table [C, H*W], matching SinusoidalPosition2DEncoder
    (is_apply_scale=True); identical for every batch element."""
    eps = 1e-6
    y_embed = np.arange(1, H + 1, dtype=np.float32) / (H + eps) * scale
    x_embed = np.arange(1, W + 1, dtype=np.float32) / (W + eps) * scale

    nf = C // 2
    dim_t = np.arange(nf, dtype=np.float32)
    dim_t = temperature ** (2.0 * np.floor(dim_t / 2.0) / nf)

    pos_y = y_embed[:, None] / dim_t                      # [H, nf]
    pos_x = x_embed[:, None] / dim_t                      # [W, nf]
    pos_y = np.stack([np.sin(pos_y[:, 0::2]), np.cos(pos_y[:, 1::2])],
                     axis=2).reshape(H, nf)
    pos_x = np.stack([np.sin(pos_x[:, 0::2]), np.cos(pos_x[:, 1::2])],
                     axis=2).reshape(W, nf)
    pos = np.concatenate(
        [np.broadcast_to(pos_y[:, None, :], (H, W, nf)),
         np.broadcast_to(pos_x[None, :, :], (H, W, nf))], axis=2)    # [H, W, C]
    return np.ascontiguousarray(
        pos.transpose(2, 0, 1).reshape(C, H * W)).astype(np.float32)  # [C, H*W]


@functools.lru_cache(maxsize=None)
def _sinusoidal_pos_1d(N, D, temperature=10000.0):
    """1D table [N, D], matching SinusoidalPosition1DEncoder."""
    pos = np.arange(1, N + 1, dtype=np.float32)
    dim_t = np.arange(D, dtype=np.float32)
    dim_t = temperature ** (2.0 * np.floor(dim_t / 2.0) / D)
    p = pos[:, None] / dim_t                              # [N, D]
    return np.stack([np.sin(p[:, 0::2]), np.cos(p[:, 1::2])],
                    axis=2).reshape(N, D).astype(np.float32)


# ----------------------------------------------------------------------------
# VaQEmbedder forward
# ----------------------------------------------------------------------------
def init_vaq_embedder_params(key, embedding_features, token_types_count=2,
                             dtype=jnp.float32):
    (k_emb,) = jax.random.split(key, 1)
    return {
        # nn.Embedding(token_types_count, C) ~ N(0, 1)
        "token_type_emb": jax.random.normal(
            k_emb, (token_types_count, embedding_features), dtype),
        # nn.LayerNorm default init
        "ln_gamma": jnp.ones((embedding_features,), dtype),
        "ln_beta": jnp.zeros((embedding_features,), dtype),
    }


@jax.jit
def vaq_embedder_forward(params, input_tv, input_tq, tv_positions, tq_positions):
    """Mirrors VaQEmbedder.forward.

    input_tv:     [B, C, H, W]   (NCHW, like PyTorch)
    input_tq:     [B, N, D]      with D == C
    tv_positions: [B, H, W]      (values unused: is_custom_position_ids=False)
    tq_positions: [B, N]
    Returns (tv_out [B, C, H, W], tq_out [B, N, D]).
    """
    B, C, H, W = input_tv.shape
    _, N, D = input_tq.shape
    del tv_positions, tq_positions  # only their shapes matter; equal to inputs'

    gamma, beta = params["ln_gamma"], params["ln_beta"]
    tv_type = params["token_type_emb"][1]   # visual tokens -> ones -> row 1
    tq_type = params["token_type_emb"][0]   # tquery tokens -> zeros -> row 0

    # --- visual path: Pallas kernel on the channel-first [B, C, H*W] view ------
    pos_cf = jnp.asarray(_sinusoidal_pos_2d_cf(H, W, C))          # [C, H*W] const
    # Fold the token-type embedding into the (tiny, batch-free) pos table so the
    # kernel has one fewer input stream.
    pos_plus_type = pos_cf + tv_type.astype(jnp.float32)[:, None]
    tv_flat = input_tv.reshape(B, C, H * W)                       # free reshape
    tv_out = fused_add_layernorm_nchw(tv_flat, pos_plus_type, gamma, beta)
    tv_out = tv_out.reshape(B, C, H, W)                           # free reshape

    # --- query path: tiny (B*N*D); plain XLA (a dedicated pallas_call for this
    #     slab would be pure launch/pipeline-warmup overhead). ------------------
    tq_pos = jnp.asarray(_sinusoidal_pos_1d(N, D))                # [N, D] const
    s = (input_tq.astype(jnp.float32) + tq_pos[None, :, :]
         + tq_type.astype(jnp.float32)[None, None, :])
    mean = jnp.mean(s, axis=-1, keepdims=True)
    var = jnp.mean((s - mean) ** 2, axis=-1, keepdims=True)
    tq_out = ((s - mean) * lax.rsqrt(var + LN_EPS)
              * gamma.astype(jnp.float32) + beta.astype(jnp.float32))
    tq_out = tq_out.astype(input_tq.dtype)

    # dropout(p=0.0) is identity; nothing to do.
    return tv_out, tq_out


# ----------------------------------------------------------------------------
# Pure-JAX references for checks
# ----------------------------------------------------------------------------
def _ref_sinusoidal_2d(positions, enc_features, temperature=10000.0,
                       scale=2.0 * math.pi):
    B, H, W = positions.shape
    ones = jnp.ones((B, H, W), jnp.float32)
    y_embed = jnp.cumsum(ones, axis=1)
    x_embed = jnp.cumsum(ones, axis=2)
    eps = 1e-6
    y_embed = y_embed / (y_embed[:, -1:, :] + eps) * scale
    x_embed = x_embed / (x_embed[:, :, -1:] + eps) * scale
    nf = enc_features // 2
    dim_t = jnp.arange(nf, dtype=jnp.float32)
    dim_t = temperature ** (2.0 * jnp.floor(dim_t / 2.0) / nf)
    pos_x = x_embed[..., None] / dim_t
    pos_y = y_embed[..., None] / dim_t
    pos_x = jnp.stack([jnp.sin(pos_x[..., 0::2]), jnp.cos(pos_x[..., 1::2])],
                      axis=4).reshape(B, H, W, nf)
    pos_y = jnp.stack([jnp.sin(pos_y[..., 0::2]), jnp.cos(pos_y[..., 1::2])],
                      axis=4).reshape(B, H, W, nf)
    return jnp.concatenate([pos_y, pos_x], axis=3)


def _ref_sinusoidal_1d(positions, enc_features, temperature=10000.0):
    B, N = positions.shape
    pos = jnp.cumsum(jnp.ones((B, N), jnp.float32), axis=1)
    dim_t = jnp.arange(enc_features, dtype=jnp.float32)
    dim_t = temperature ** (2.0 * jnp.floor(dim_t / 2.0) / enc_features)
    p = pos[..., None] / dim_t
    return jnp.stack([jnp.sin(p[..., 0::2]), jnp.cos(p[..., 1::2])],
                     axis=3).reshape(B, N, enc_features)


def _ref_forward(params, input_tv, input_tq, tv_positions, tq_positions):
    B, C, H, W = input_tv.shape
    _, N, D = input_tq.shape
    tv_pos = jnp.broadcast_to(_ref_sinusoidal_2d(tv_positions, C), (B, H, W, C))
    tq_pos = jnp.broadcast_to(_ref_sinusoidal_1d(tq_positions, D), (B, N, D))
    tv_type = params["token_type_emb"][1]
    tq_type = params["token_type_emb"][0]

    def ln(x):
        mean = jnp.mean(x, axis=-1, keepdims=True)
        var = jnp.mean((x - mean) ** 2, axis=-1, keepdims=True)
        return ((x - mean) / jnp.sqrt(var + LN_EPS)
                * params["ln_gamma"] + params["ln_beta"])

    tv = input_tv + tv_pos.transpose(0, 3, 1, 2) + tv_type[None, :, None, None]
    tq = input_tq + tq_pos + tq_type[None, None, :]
    tv = tv.reshape(B, C, H * W).transpose(0, 2, 1)
    tv = ln(tv)
    tq = ln(tq)
    tv = tv.transpose(0, 2, 1).reshape(B, C, H, W)
    return tv, tq


def _ref_ln_over_c(x_bc_hw, pos_cf, gamma, beta):
    """Reference for direct fused_add_layernorm_nchw calls ([B, C, HW] layout)."""
    s = x_bc_hw.astype(jnp.float32) + pos_cf.astype(jnp.float32)[None]
    mean = jnp.mean(s, axis=1, keepdims=True)
    var = jnp.mean((s - mean) ** 2, axis=1, keepdims=True)
    out = ((s - mean) * lax.rsqrt(var + LN_EPS)
           * gamma.astype(jnp.float32)[None, :, None]
           + beta.astype(jnp.float32)[None, :, None])
    return out.astype(x_bc_hw.dtype)


if __name__ == "__main__":
    key = jax.random.PRNGKey(0)
    k_tv, k_tq, k_p, k_x2, k_pos2, k_x3, k_pos3, k_g, k_b = jax.random.split(key, 9)

    # ---- 1) Full module forward at small shapes vs reference -----------------
    B, C, H, W = 2, 32, 16, 16   # embedding_features = 32
    N, D = 8, C

    input_tv = jax.random.normal(k_tv, (B, C, H, W), jnp.float32)
    input_tq = jax.random.normal(k_tq, (B, N, D), jnp.float32)
    # values irrelevant (is_custom_position_ids=False): only shapes are used
    tv_positions = jnp.zeros((B, H, W), jnp.float32)
    tq_positions = jnp.zeros((B, N), jnp.float32)

    params = init_vaq_embedder_params(k_p, C)

    tv_out, tq_out = vaq_embedder_forward(
        params, input_tv, input_tq, tv_positions, tq_positions)
    jax.block_until_ready((tv_out, tq_out))

    tv_ref, tq_ref = _ref_forward(
        params, input_tv, input_tq, tv_positions, tq_positions)

    assert tv_out.shape == (B, C, H, W) and tq_out.shape == (B, N, D)
    assert jnp.allclose(tv_out, tv_ref, atol=1e-5, rtol=1e-5)
    assert jnp.allclose(tq_out, tq_ref, atol=1e-5, rtol=1e-5)

    # ---- 2) Multi-tile cdiv grid + masked boundary block (HW % 128 != 0) -----
    HW2 = 20 * 30   # 600 lanes -> tile 512 with a 64 KiB target -> 2 tiles
    x2 = jax.random.normal(k_x2, (2, 32, HW2), jnp.float32)
    pos2 = jax.random.normal(k_pos2, (32, HW2), jnp.float32)
    gamma2 = 1.0 + 0.1 * jax.random.normal(k_g, (32,), jnp.float32)
    beta2 = 0.05 * jax.random.normal(k_b, (32,), jnp.float32)
    y2 = fused_add_layernorm_nchw(x2, pos2, gamma2, beta2,
                                  target_block_bytes=64 * 1024)
    jax.block_until_ready(y2)
    assert jnp.allclose(y2, _ref_ln_over_c(x2, pos2, gamma2, beta2),
                        atol=1e-5, rtol=1e-5)

    # ---- 3) One-pass statistics path (C >= 256) -------------------------------
    C3, HW3 = 256, 384
    x3 = jax.random.normal(k_x3, (2, C3, HW3), jnp.float32)
    pos3 = jax.random.normal(k_pos3, (C3, HW3), jnp.float32)
    gamma3 = jnp.ones((C3,), jnp.float32)
    beta3 = jnp.zeros((C3,), jnp.float32)
    y3 = fused_add_layernorm_nchw(x3, pos3, gamma3, beta3)
    jax.block_until_ready(y3)
    assert jnp.allclose(y3, _ref_ln_over_c(x3, pos3, gamma3, beta3),
                        atol=2e-5, rtol=1e-5)

    print("KERNEL_OK")
</pallas_src>

<mosaic_0001>
module attributes {stable_mosaic.version = 11 : i64} {
  func.func @kernel(%arg0: i32, %arg1: i32, %arg2: memref<1x32x256xf32, #tpu.memory_space<vmem>>, %arg3: memref<32x256xf32, #tpu.memory_space<vmem>>, %arg4: memref<32x1xf32, #tpu.memory_space<vmem>>, %arg5: memref<32x1xf32, #tpu.memory_space<vmem>>, %arg6: memref<1x32x256xf32, #tpu.memory_space<vmem>>) attributes {dimension_semantics = [#tpu.dimension_semantics<parallel>, #tpu.dimension_semantics<parallel>], iteration_bounds = array<i64: 1, 2>, scalar_prefetch = 0 : i64, scratch_operands = 0 : i64, tpu.core_type = #tpu.core_type<tc>, window_params = [{transform_indices = @transform_0, window_bounds = array<i64: 1, 32, 256>}, {transform_indices = @transform_1, window_bounds = array<i64: 32, 256>}, {pipeline_mode = #tpu.pipeline_mode<synchronous>, transform_indices = @transform_2, window_bounds = array<i64: 32, 1>}, {pipeline_mode = #tpu.pipeline_mode<synchronous>, transform_indices = @transform_3, window_bounds = array<i64: 32, 1>}, {transform_indices = @transform_4, window_bounds = array<i64: 1, 32, 256>}]} {
    %c0 = arith.constant 0 : index
    %c0_0 = arith.constant 0 : index
    %c0_1 = arith.constant 0 : index
    %0 = vector.load %arg2[%c0, %c0_0, %c0_1] : memref<1x32x256xf32, #tpu.memory_space<vmem>>, vector<1x32x256xf32>
    %1 = vector.shape_cast %0 : vector<1x32x256xf32> to vector<32x256xf32>
    %c0_2 = arith.constant 0 : index
    %c0_3 = arith.constant 0 : index
    %2 = vector.load %arg3[%c0_2, %c0_3] : memref<32x256xf32, #tpu.memory_space<vmem>>, vector<32x256xf32>
    %c0_4 = arith.constant 0 : index
    %c0_5 = arith.constant 0 : index
    %3 = vector.load %arg4[%c0_4, %c0_5] : memref<32x1xf32, #tpu.memory_space<vmem>>, vector<32x1xf32>
    %c0_6 = arith.constant 0 : index
    %c0_7 = arith.constant 0 : index
    %4 = vector.load %arg5[%c0_6, %c0_7] : memref<32x1xf32, #tpu.memory_space<vmem>>, vector<32x1xf32>
    %5 = arith.addf %1, %2 : vector<32x256xf32>
    %cst = arith.constant dense<0.000000e+00> : vector<256xf32>
    %6 = vector.multi_reduction <add>, %5, %cst [0] : vector<32x256xf32> to vector<256xf32>
    %7 = vector.shape_cast %6 : vector<256xf32> to vector<1x256xf32>
    %cst_8 = arith.constant 3.200000e+01 : f32
    %8 = vector.broadcast %cst_8 : f32 to vector<1x256xf32>
    %9 = arith.divf %7, %8 : vector<1x256xf32>
    %10 = vector.broadcast %9 : vector<1x256xf32> to vector<32x256xf32>
    %11 = arith.subf %5, %10 : vector<32x256xf32>
    %12 = arith.mulf %11, %11 : vector<32x256xf32>
    %cst_9 = arith.constant dense<0.000000e+00> : vector<256xf32>
    %13 = vector.multi_reduction <add>, %12, %cst_9 [0] : vector<32x256xf32> to vector<256xf32>
    %14 = vector.shape_cast %13 : vector<256xf32> to vector<1x256xf32>
    %cst_10 = arith.constant 3.200000e+01 : f32
    %15 = vector.broadcast %cst_10 : f32 to vector<1x256xf32>
    %16 = arith.divf %14, %15 : vector<1x256xf32>
    %cst_11 = arith.constant 9.99999996E-13 : f32
    %17 = vector.broadcast %cst_11 : f32 to vector<1x256xf32>
    %18 = arith.addf %16, %17 : vector<1x256xf32>
    %19 = math.rsqrt %18 : vector<1x256xf32>
    %20 = vector.broadcast %19 : vector<1x256xf32> to vector<32x256xf32>
    %21 = vector.broadcast %3 : vector<32x1xf32> to vector<32x256xf32>
    %22 = arith.mulf %20, %21 : vector<32x256xf32>
    %23 = arith.mulf %11, %22 : vector<32x256xf32>
    %24 = vector.broadcast %4 : vector<32x1xf32> to vector<32x256xf32>
    %25 = arith.addf %23, %24 : vector<32x256xf32>
    %c0_12 = arith.constant 0 : index
    %c0_13 = arith.constant 0 : index
    %c0_14 = arith.constant 0 : index
    %26 = vector.load %arg6[%c0_12, %c0_13, %c0_14] : memref<1x32x256xf32, #tpu.memory_space<vmem>>, vector<1x32x256xf32>
    %27 = vector.shape_cast %26 : vector<1x32x256xf32> to vector<32x256xf32>
    %28 = vector.shape_cast %25 : vector<32x256xf32> to vector<1x32x256xf32>
    tpu.vector_store %arg6[%c0_12, %c0_13, %c0_14], %28 {strides = array<i32>} : memref<1x32x256xf32, #tpu.memory_space<vmem>>, vector<1x32x256xf32>,
    return
  }
  func.func @transform_0(%arg0: i32, %arg1: i32) -> (i32, i32, i32) {
    %c0_i32 = arith.constant 0 : i32
    %c0_i32_0 = arith.constant 0 : i32
    return %arg1, %c0_i32, %arg0 : i32, i32, i32
  }
  func.func @transform_1(%arg0: i32, %arg1: i32) -> (i32, i32) {
    %c0_i32 = arith.constant 0 : i32
    %c0_i32_0 = arith.constant 0 : i32
    return %c0_i32, %arg0 : i32, i32
  }
  func.func @transform_2(%arg0: i32, %arg1: i32) -> (i32, i32) {
    %c0_i32 = arith.constant 0 : i32
    %c0_i32_0 = arith.constant 0 : i32
    %c0_i32_1 = arith.constant 0 : i32
    return %c0_i32, %c0_i32_0 : i32, i32
  }
  func.func @transform_3(%arg0: i32, %arg1: i32) -> (i32, i32) {
    %c0_i32 = arith.constant 0 : i32
    %c0_i32_0 = arith.constant 0 : i32
    %c0_i32_1 = arith.constant 0 : i32
    return %c0_i32, %c0_i32_0 : i32, i32
  }
  func.func @transform_4(%arg0: i32, %arg1: i32) -> (i32, i32, i32) {
    %c0_i32 = arith.constant 0 : i32
    %c0_i32_0 = arith.constant 0 : i32
    return %arg1, %c0_i32, %arg0 : i32, i32, i32
  }
}

</mosaic_0001>

<bundles_post_ra>
// kernel: vaq_embedder_forward.1
= control target key start
LH: loop header
LB: loop body
LE: loop exit
PB: predicated region body
PF: predicated region fallthrough
CT: control target
= control target key end

     0   :  { %s621_s15 = smov 0   ;;  %s623_s16 = smov 0   ;;  %s719_s0 = inlined_call_operand.vmem [shape: f32[2,32,256], index: 0, kind: input, shape index: {}]   ;;  %s720_s1 = inlined_call_operand.vmem [shape: f32[32,256], index: 1, kind: input, shape index: {}]   ;;  %s721_s2 = inlined_call_operand.vmem [shape: f32[32,1], index: 2, kind: input, shape index: {}]   ;;  %s722_s3 = inlined_call_operand.vmem [shape: f32[32,1], index: 3, kind: input, shape index: {}]   ;;  %s723_s4 = inlined_call_operand.vmem [shape: f32[2,32,256], index: 4, kind: output, shape index: {}]  }
   0x1   :  { %s625_s17 = smov 0  }
   0x2 LB: > { %s23_s18 = sadd.s32 1, %s589_s16  ;;  %p531_p0 = scmp.ge.s32.totalorder %s593_s17, 1  ;;  %s593_s17 = sphi %s625_s17, %s14_s17   ;;  %s589_s16 = sphi %s623_s16, %s725_s16   ;;  %s585_s15 = sphi %s621_s15, %s724_s15  }
   0x3   : > { %p24_p1 = scmp.ge.s32.totalorder %s23_s18, 2  ;;  %p194_p2 = scmp.lt.s32.totalorder %s593_s17, 3 }
   0x5   : > { %s727_s18 = smov (%p24_p1, %s23_s18), 0  ;;  %p195_p3 = pnand %p531_p0, %p194_p2 }
   0x6   : > { %v277_v0 = vld [vmem:[%s721_s2 + $0x10] sm:$0xff] (!%p195_p3)  ;;  %v275_v1 = vld [vmem:[%s721_s2] sm:$0xff] (!%p195_p3)  ;;  %v595_v2 = vmov (!%p195_p3), 0   ;;  %v278_v3 = vld [vmem:[%s721_s2 + $0x18] sm:$0xff] (!%p195_p3)  ;;  %p234_p4 = scmp.lt.s32.totalorder (!%p195_p3), %s585_s15, 1 }
   0x7   : > { %198 = sbr.rel (%p195_p3) target bundleno = 152 (0x98), region = 36  ;;  %566 = vset.pattern.permute.xlu1 (!%p195_p3), %v595_v2  ;;  %565 = vset.pattern.permute.xlu0 (!%p195_p3), %v595_v2  ;;  %v276_v4 = vld [vmem:[%s721_s2 + $0x8] sm:$0xff] (!%p195_p3)  ;;  %v279_v6 = vld [vmem:[%s722_s3] sm:$0xff] (!%p195_p3)  ;;  %v282_v7 = vld [vmem:[%s722_s3 + $0x18] sm:$0xff] (!%p195_p3) }
   0x8   : > { %364 = vperm.xlu1 (!%p195_p3), %566, %v277_v0   ;;  %354 = vperm.xlu0 (!%p195_p3), %565, %v275_v1   ;;  %v280_v5 = vld [vmem:[%s722_s3 + $0x8] sm:$0xff] (!%p195_p3)  ;;  %v281_v8 = vld [vmem:[%s722_s3 + $0x10] sm:$0xff] (!%p195_p3)  ;;  %v267_v9 = vld [vmem:[%s720_s1] sm:$0xff] (!%p195_p3) }
   0x9   : > { %v268_v10 = vld [vmem:[%s720_s1 + $0x8] sm:$0xff] (!%p195_p3)  ;;  %v269_v13 = vld [vmem:[%s720_s1 + $0x10] sm:$0xff] (!%p195_p3)  ;;  %v270_v16 = vld [vmem:[%s720_s1 + $0x18] sm:$0xff] (!%p195_p3) }
   0xa   : > { %v271_v20 = vld [vmem:[%s720_s1 + $0x20] sm:$0xff] (!%p195_p3)  ;;  %v272_v24 = vld [vmem:[%s720_s1 + $0x28] sm:$0xff] (!%p195_p3)  ;;  %v273_v28 = vld [vmem:[%s720_s1 + $0x30] sm:$0xff] (!%p195_p3) }
   0xb   : > { %v274_v32 = vld [vmem:[%s720_s1 + $0x38] sm:$0xff] (!%p195_p3) }
   0xc   : > { %369 = vperm.xlu1 (!%p195_p3), %566, %v278_v3   ;;  %359 = vperm.xlu0 (!%p195_p3), %565, %v276_v4  }
   0xe   : > { %s729_s15 = smov (!%p234_p4, %s585_s15), 1 }
   0xf   : > { %s538_s9 = sshll.u32 %s729_s15, 6 }
  0x10   : > { %395 = vperm.xlu1 %566, %v280_v5   ;;  %390 = vperm.xlu0 %565, %v279_v6   ;;  %s241_s12 = scalar_lea.vmem %s719_s0, %s538_s9  ;;  %s257_s10 = scalar_lea.vmem %s723_s4, %s538_s9 }
  0x11   : > { %v259_v11 = vld [vmem:[%s241_s12] sm:$0xff]  ;;  %v261_v12 = vld [vmem:[%s241_s12 + $0x10] sm:$0xff]  ;;  %v260_v14 = vld [vmem:[%s241_s12 + $0x8] sm:$0xff] }
  0x12   : > { %v262_v15 = vld [vmem:[%s241_s12 + $0x18] sm:$0xff]  ;;  %v283_v17 = vadd.f32 %v267_v9, %v259_v11  ;;  %v285_v18 = vadd.f32 %v269_v13, %v261_v12  ;;  %v263_v19 = vld [vmem:[%s241_s12 + $0x20] sm:$0xff]  ;;  %v284_v21 = vadd.f32 %v268_v10, %v260_v14  ;;  %v264_v23 = vld [vmem:[%s241_s12 + $0x28] sm:$0xff] }
  0x13   : > { %v286_v22 = vadd.f32 %v270_v16, %v262_v15  ;;  %v287_v25 = vadd.f32 %v271_v20, %v263_v19  ;;  %v265_v27 = vld [vmem:[%s241_s12 + $0x30] sm:$0xff]  ;;  %v288_v29 = vadd.f32 %v272_v24, %v264_v23  ;;  %v266_v31 = vld [vmem:[%s241_s12 + $0x38] sm:$0xff] }
  0x14   : > { %405 = vperm.xlu1 %566, %v282_v7   ;;  %400 = vperm.xlu0 %565, %v281_v8   ;;  %v291_v26 = vadd.f32 %v285_v18, %v283_v17  ;;  %v289_v33 = vadd.f32 %v273_v28, %v265_v27  ;;  %v290_v35 = vadd.f32 %v274_v32, %v266_v31 }
  0x15   : > { %v300_v30 = vadd.f32 %v286_v22, %v284_v21 }
  0x16   : > { %v292_v34 = vadd.f32 %v291_v26, %v287_v25 }
  0x17   : > { %v301_v36 = vadd.f32 %v300_v30, %v288_v29 }
  0x18   : > { %v293_v37 = vadd.f32 %v292_v34, %v289_v33 }
  0x19   : > { %v302_v38 = vadd.f32 %v301_v36, %v290_v35 }
  0x1a   : > { %v294_v39 = vrot.slane %v293_v37, 4 }
  0x1b   : > { %v303_v40 = vrot.slane %v302_v38, 4 }
  0x1c   : > { %v295_v41 = vadd.f32 %v294_v39, %v293_v37 }
  0x1d   : > { %v304_v42 = vadd.f32 %v303_v40, %v302_v38 }
  0x1e   : > { %v296_v43 = vrot.slane %v295_v41, 2 }
  0x1f   : > { %v305_v44 = vrot.slane %v304_v42, 2 }
  0x20   : > { %v297_v45 = vadd.f32 %v296_v43, %v295_v41 }
  0x21   : > { %v306_v46 = vadd.f32 %v305_v44, %v304_v42 }
  0x22   : > { %v298_v47 = vrot.slane %v297_v45, 1 }
  0x23   : > { %v307_v48 = vrot.slane %v306_v46, 1 }
  0x24   : > { %v299_v49 = vadd.f32 %v298_v47, %v297_v45 }
  0x25   : > { %v308_v50 = vadd.f32 %v307_v48, %v306_v46 }
  0x26   : > { %v310_v51 = vmul.f32 0.03125, %v299_v49 }
  0x27   : > { %v311_v52 = vmul.f32 0.03125, %v308_v50 }
  0x28   : > { %v312_v53 = vsub.f32 %v283_v17, %v310_v51  ;;  %v314_v54 = vsub.f32 %v285_v18, %v310_v51  ;;  %v695_v57 = vsub.f32 %v287_v25, %v310_v51  ;;  %v318_v63 = vsub.f32 %v289_v33, %v310_v51 }
  0x29   : > { %v313_v55 = vsub.f32 %v284_v21, %v311_v52  ;;  %v315_v56 = vsub.f32 %v286_v22, %v311_v52  ;;  %v697_v60 = vsub.f32 %v288_v29, %v311_v52  ;;  %v319_v2 = vsub.f32 %v290_v35, %v311_v52 }
  0x2a   : > { %v320_v58 = vmul.f32 %v312_v53, %v312_v53  ;;  %v322_v59 = vmul.f32 %v314_v54, %v314_v54  ;;  %v324_v0 = vmul.f32 %v695_v57, %v695_v57  ;;  %v326_v5 = vmul.f32 %v318_v63, %v318_v63 }
  0x2b   : > { %v321_v61 = vmul.f32 %v313_v55, %v313_v55  ;;  %v323_v62 = vmul.f32 %v315_v56, %v315_v56  ;;  %v325_v3 = vmul.f32 %v697_v60, %v697_v60  ;;  %v327_v7 = vmul.f32 %v319_v2, %v319_v2 }
  0x2c   : > { %v328_v1 = vadd.f32 %v322_v59, %v320_v58 }
  0x2d   : > { %v337_v4 = vadd.f32 %v323_v62, %v321_v61 }
  0x2e   : > { %v329_v6 = vadd.f32 %v328_v1, %v324_v0 }
  0x2f   : > { %v338_v8 = vadd.f32 %v337_v4, %v325_v3 }
  0x30   : > { %v330_v9 = vadd.f32 %v329_v6, %v326_v5 }
  0x31   : > { %v339_v10 = vadd.f32 %v338_v8, %v327_v7 }
  0x32   : > { %v331_v11 = vrot.slane %v330_v9, 4 }
  0x33   : > { %v340_v12 = vrot.slane %v339_v10, 4 }
  0x34   : > { %v332_v13 = vadd.f32 %v331_v11, %v330_v9 }
  0x35   : > { %v341_v14 = vadd.f32 %v340_v12, %v339_v10 }
  0x36   : > { %v333_v15 = vrot.slane %v332_v13, 2 }
  0x37   : > { %v342_v16 = vrot.slane %v341_v14, 2 }
  0x38   : > { %v334_v17 = vadd.f32 %v333_v15, %v332_v13 }
  0x39   : > { %v343_v18 = vadd.f32 %v342_v16, %v341_v14 }
  0x3a   : > { %v335_v19 = vrot.slane %v334_v17, 1 }
  0x3b   : > { %v344_v20 = vrot.slane %v343_v18, 1 }
  0x3c   : > { %v336_v21 = vadd.f32 %v335_v19, %v334_v17 }
  0x3d   : > { %v345_v22 = vadd.f32 %v344_v20, %v343_v18 }
  0x3e   : > { %v346_v23 = vmul.f32 0.03125, %v336_v21 }
  0x3f   : > { %v347_v24 = vmul.f32 0.03125, %v345_v22 }
  0x40   : > { %v348_v25 = vadd.f32 1e-12, %v346_v23 }
  0x41   : > { %v349_v26 = vadd.f32 1e-12, %v347_v24 }
  0x42   : > { %567 = vrsqrt.f32 %v348_v25 }
  0x43   : > { %569 = vrsqrt.f32 %v349_v26 }
  0x4c   : > { %v568_v27 = vpop.eup %567 }
  0x4d   : > { %v570_v28 = vpop.eup %569 }
  0x87   : > { %v365_v29 = vpop.permute.xlu1 %364  ;;  %v355_v30 = vpop.permute.xlu0 %354 }
  0x88   : > { %v372_v31 = vmul.f32 %v568_v27, %v355_v30  ;;  %v373_v32 = vmul.f32 %v570_v28, %v355_v30  ;;  %v376_v37 = vmul.f32 %v568_v27, %v365_v29  ;;  %v377_v38 = vmul.f32 %v570_v28, %v365_v29 }
  0x8a   : > { %v380_v39 = vmul.f32 %v372_v31, %v312_v53  ;;  %v381_v40 = vmul.f32 %v373_v32, %v313_v55  ;;  %v384_v53 = vmul.f32 %v376_v37, %v695_v57 }
  0x8b   : > { %v370_v33 = vpop.permute.xlu1 %369  ;;  %v360_v34 = vpop.permute.xlu0 %359 }
  0x8c   : > { %v374_v35 = vmul.f32 %v568_v27, %v360_v34  ;;  %v375_v36 = vmul.f32 %v570_v28, %v360_v34  ;;  %v378_v41 = vmul.f32 %v568_v27, %v370_v33  ;;  %v379_v42 = vmul.f32 %v570_v28, %v370_v33 }
  0x8e   : > { %v382_v43 = vmul.f32 %v374_v35, %v314_v54  ;;  %v383_v44 = vmul.f32 %v375_v36, %v315_v56  ;;  %v386_v51 = vmul.f32 %v378_v41, %v318_v63  ;;  %v387_v52 = vmul.f32 %v379_v42, %v319_v2 }
  0x8f   : > { %v396_v45 = vpop.permute.xlu1 %395  ;;  %v391_v46 = vpop.permute.xlu0 %390  ;;  %v385_v54 = vmul.f32 %v377_v38, %v697_v60 }
  0x90   : > { %v410_v47 = vadd.f32 %v396_v45, %v382_v43  ;;  %v411_v48 = vadd.f32 %v396_v45, %v383_v44  ;;  %v408_v49 = vadd.f32 %v391_v46, %v380_v39  ;;  %v409_v50 = vadd.f32 %v391_v46, %v381_v40 }
  0x92   : > { %418 = vst [vmem:[%s257_s10 + $0x10] sm:$0xff] %v410_v47  ;;  %419 = vst [vmem:[%s257_s10 + $0x18] sm:$0xff] %v411_v48 }
  0x93   : > { %416 = vst [vmem:[%s257_s10] sm:$0xff] %v408_v49  ;;  %417 = vst [vmem:[%s257_s10 + $0x8] sm:$0xff] %v409_v50  ;;  %v406_v55 = vpop.permute.xlu1 %405  ;;  %v401_v56 = vpop.permute.xlu0 %400 }
  0x94   : > { %v414_v58 = vadd.f32 %v406_v55, %v386_v51  ;;  %v415_v59 = vadd.f32 %v406_v55, %v387_v52  ;;  %v412_v61 = vadd.f32 %v401_v56, %v384_v53  ;;  %v413_v62 = vadd.f32 %v401_v56, %v385_v54 }
  0x96   : > { %422 = vst [vmem:[%s257_s10 + $0x30] sm:$0xff] %v414_v58  ;;  %423 = vst [vmem:[%s257_s10 + $0x38] sm:$0xff] %v415_v59 }
  0x97   : > { %420 = vst [vmem:[%s257_s10 + $0x20] sm:$0xff] %v412_v61  ;;  %421 = vst [vmem:[%s257_s10 + $0x28] sm:$0xff] %v413_v62 }
  0x98 PF: > { %s14_s17 = sadd.s32 1, %s593_s17   ;;  %s724_s15 = smov %s589_s16 }
  0x99   : > { %p11_p5 = scmp.ge.s32.totalorder %s14_s17, 4   ;;  %s725_s16 = smov %s727_s18 }
  0x9b   :  { %13 = sbr.rel (!%p11_p5) target bundleno = 2 (0x2), region = 69 }

</bundles_post_ra>
